<compile_context>
chip_gen: v6e
topology: v6e:2x2x1
jax: 0.10.0
libtpu: 0.0.40
codegen_flags: <defaults>
</compile_context>

<pallas_src>
import functools

import jax
import jax.numpy as jnp
from jax.experimental import pallas as pl
from jax.experimental.pallas import tpu as pltpu


def _round_up(x: int, m: int) -> int:
    return (x + m - 1) // m * m


def _pick_vmem_limit() -> int:
    """Budget scoped VMEM from the actual chip when query is available."""
    try:
        cap = pltpu.get_tpu_info().vmem_capacity_bytes
        # leave headroom; cap at 100 MiB on 128 MiB parts, ~48 MiB on v7x.
        return int(min(cap * 3 // 4, 100 << 20))
    except Exception:
        return 48 << 20  # safe on v5e/v6e (128 MiB) and v7x (64 MiB)


def _resident_spec(shape):
    """Constant-index (VMEM-resident) block; single-buffered when supported."""
    ndim = len(shape)
    idx = lambda i: (0,) * ndim
    try:
        return pl.BlockSpec(shape, idx, pipeline_mode=pl.Buffered(1))
    except Exception:
        return pl.BlockSpec(shape, idx)


def _make_mlp_kernel(num_layers: int, sigmoid_output: bool):
    """Fused MLP kernel: all layers' matmuls + bias + activations in one body."""

    def kernel(*refs):
        x_ref = refs[0]
        w_refs = refs[1:1 + num_layers]
        b_refs = refs[1 + num_layers:1 + 2 * num_layers]
        o_ref = refs[1 + 2 * num_layers]

        h = x_ref[...]                                    # already bf16
        for i in range(num_layers):
            acc = jnp.dot(h, w_refs[i][...],
                          preferred_element_type=jnp.float32)   # MXU, f32 acc
            acc = acc + b_refs[i][...]                          # f32 bias (VPU)
            if i < num_layers - 1:
                h = jnp.maximum(acc, 0.0).astype(jnp.bfloat16)  # ReLU, back to bf16
            else:
                h = acc
        if sigmoid_output:
            h = jax.nn.sigmoid(h)                               # EUP, No lanes only
        o_ref[...] = h.astype(o_ref.dtype)

    return kernel


def prepare_mlp_params(weights, biases):
    """Pad + cast parameters ONCE (hoisted out of the per-call path).

    weights: list of (in_dim_i, out_dim_i) arrays (torch Linear weight, transposed)
    biases:  list of (out_dim_i,) arrays
    Returns (w_list bf16, b_list f32) with per-layer padded widths:
      layer i weight -> (K_i, round_up(N_i,128)),  K_0 = true in_dim,
      K_i (i>0)      =  round_up(N_{i-1},128)  (chain-consistent).
    """
    w_list, b_list = [], []
    for i, (w, b) in enumerate(zip(weights, biases)):
        k, n = w.shape
        kp = k if i == 0 else _round_up(k, 128)
        np_ = _round_up(n, 128)
        wp = jnp.zeros((kp, np_), jnp.bfloat16).at[:k, :n].set(
            w.astype(jnp.bfloat16))
        bp = jnp.zeros((1, np_), jnp.float32).at[0, :n].set(
            b.astype(jnp.float32))
        w_list.append(wp)
        b_list.append(bp)
    return w_list, b_list


@functools.partial(jax.jit,
                   static_argnames=("out_dim", "sigmoid_output", "tile_m_max"))
def mlp_pallas(x, w_list, b_list, *, out_dim: int,
               sigmoid_output: bool = False, tile_m_max: int = 1024):
    """MLP forward via a single fused, M-tiled Pallas TPU kernel.

    x:      (..., input_dim) float32
    w_list: per-layer padded bf16 weights (from prepare_mlp_params)
    b_list: per-layer padded f32 biases
    """
    num_layers = len(w_list)
    orig_lead = x.shape[:-1]
    in_dim = x.shape[-1]
    no = w_list[-1].shape[1]                     # padded output width (>=128)

    x2 = x.reshape(-1, in_dim)
    M = x2.shape[0]

    ALIGN = 16                                   # bf16 sublane packing friendly

    # --- VMEM budget -> row tile size -------------------------------------
    vmem_limit = _pick_vmem_limit()
    weight_bytes = sum(int(w.size) * 2 for w in w_list) \
        + sum(int(b.size) * 4 for b in b_list)
    max_width = max(int(w.shape[1]) for w in w_list)
    # streamed x/out double-buffered + rough unrolled f32 temporaries per row
    per_row = 2 * 2 * in_dim + 2 * 2 * no + 4 * 4 * max_width
    budget = max(vmem_limit - 2 * weight_bytes, 1 << 20)
    tile_budget = max(ALIGN, (budget // per_row) // ALIGN * ALIGN)
    tile_cap = max(ALIGN, min(tile_m_max, tile_budget))

    num_tiles = max(pl.cdiv(M, tile_cap), 1)
    if num_tiles == 1 and M >= 256:
        num_tiles = 2                            # v7x: give the 2nd TC work
    tile_m = _round_up(pl.cdiv(M, num_tiles), ALIGN)
    Mp = tile_m * num_tiles

    # --- pad rows only, cast to bf16 (fused) -------------------------------
    x_bf = x2.astype(jnp.bfloat16)
    if Mp != M:
        xp = jnp.zeros((Mp, in_dim), jnp.bfloat16).at[:M, :].set(x_bf)
    else:
        xp = x_bf

    kernel = _make_mlp_kernel(num_layers, sigmoid_output)

    in_specs = [pl.BlockSpec((tile_m, in_dim), lambda i: (i, 0))]
    in_specs += [_resident_spec(tuple(w.shape)) for w in w_list]
    in_specs += [_resident_spec(tuple(b.shape)) for b in b_list]

    out_p = pl.pallas_call(
        kernel,
        out_shape=jax.ShapeDtypeStruct((Mp, no), jnp.bfloat16),
        grid=(num_tiles,),
        in_specs=in_specs,
        out_specs=pl.BlockSpec((tile_m, no), lambda i: (i, 0)),
        compiler_params=pltpu.CompilerParams(
            dimension_semantics=("parallel",),   # shard row tiles across TCs (v7x)
            vmem_limit_bytes=vmem_limit,
        ),
    )(xp, *w_list, *b_list)

    out = out_p[:M, :out_dim].astype(x.dtype)
    return out.reshape(*orig_lead, out_dim)


def init_mlp_params(key, input_dim, hidden_dim, output_dim, num_layers):
    """Deterministic synthetic params with the same shapes as the torch module."""
    h = [hidden_dim] * (num_layers - 1)
    in_dims = [input_dim] + h
    out_dims = h + [output_dim]
    weights, biases = [], []
    for n, k in zip(in_dims, out_dims):
        key, kw, kb = jax.random.split(key, 3)
        bound = 1.0 / (n ** 0.5)
        # stored as (in, out) — i.e. torch Linear weight (out, in) transposed
        w = jax.random.uniform(kw, (n, k), jnp.float32, -bound, bound)
        b = jax.random.uniform(kb, (k,), jnp.float32, -bound, bound)
        weights.append(w)
        biases.append(b)
    return weights, biases


def mlp_reference(x, weights, biases, sigmoid_output=False):
    num_layers = len(weights)
    h = x
    for i, (w, b) in enumerate(zip(weights, biases)):
        h = h @ w + b
        if i < num_layers - 1:
            h = jnp.maximum(h, 0.0)
    if sigmoid_output:
        h = jax.nn.sigmoid(h)
    return h


if __name__ == "__main__":
    # Small shapes consistent with the SAM mask-decoder MLP head usage:
    # x: (batch, tokens, input_dim)
    input_dim, hidden_dim, output_dim, num_layers = 32, 64, 16, 3
    sigmoid_output = True

    key = jax.random.PRNGKey(0)
    key, kx = jax.random.split(key)
    x = jax.random.normal(kx, (2, 8, input_dim), jnp.float32)

    weights, biases = init_mlp_params(key, input_dim, hidden_dim,
                                      output_dim, num_layers)

    # Parameter padding / stacking happens once, outside the per-call path.
    w_list, b_list = prepare_mlp_params(weights, biases)

    out = mlp_pallas(x, w_list, b_list, out_dim=output_dim,
                     sigmoid_output=sigmoid_output)
    out = jax.block_until_ready(out)

    ref = mlp_reference(x, weights, biases, sigmoid_output=sigmoid_output)
    assert out.shape == (2, 8, output_dim), out.shape
    # bf16 matmul operands / streamed activations with f32 accumulation ->
    # relaxed tolerance vs the f32 reference.
    assert jnp.allclose(out, ref, atol=2e-2, rtol=2e-2), "mismatch vs reference"

    print("KERNEL_OK")
</pallas_src>

<mosaic_0001>
module attributes {stable_mosaic.version = 11 : i64} {
  func.func @kernel(%arg0: i32, %arg1: memref<16x32xbf16, #tpu.memory_space<vmem>>, %arg2: memref<32x128xbf16, #tpu.memory_space<vmem>>, %arg3: memref<128x128xbf16, #tpu.memory_space<vmem>>, %arg4: memref<128x128xbf16, #tpu.memory_space<vmem>>, %arg5: memref<1x128xf32, #tpu.memory_space<vmem>>, %arg6: memref<1x128xf32, #tpu.memory_space<vmem>>, %arg7: memref<1x128xf32, #tpu.memory_space<vmem>>, %arg8: memref<16x128xbf16, #tpu.memory_space<vmem>>) attributes {dimension_semantics = [#tpu.dimension_semantics<parallel>], iteration_bounds = array<i64: 1>, scalar_prefetch = 0 : i64, scratch_operands = 0 : i64, tpu.core_type = #tpu.core_type<tc>, window_params = [{transform_indices = @transform_0, window_bounds = array<i64: 16, 32>}, {pipeline_mode = #tpu.pipeline_mode<synchronous>, transform_indices = @transform_1, window_bounds = array<i64: 32, 128>}, {pipeline_mode = #tpu.pipeline_mode<synchronous>, transform_indices = @transform_2, window_bounds = array<i64: 128, 128>}, {pipeline_mode = #tpu.pipeline_mode<synchronous>, transform_indices = @transform_3, window_bounds = array<i64: 128, 128>}, {pipeline_mode = #tpu.pipeline_mode<synchronous>, transform_indices = @transform_4, window_bounds = array<i64: 1, 128>}, {pipeline_mode = #tpu.pipeline_mode<synchronous>, transform_indices = @transform_5, window_bounds = array<i64: 1, 128>}, {pipeline_mode = #tpu.pipeline_mode<synchronous>, transform_indices = @transform_6, window_bounds = array<i64: 1, 128>}, {transform_indices = @transform_7, window_bounds = array<i64: 16, 128>}]} {
    %c0 = arith.constant 0 : index
    %c0_0 = arith.constant 0 : index
    %0 = vector.load %arg1[%c0, %c0_0] : memref<16x32xbf16, #tpu.memory_space<vmem>>, vector<16x32xbf16>
    %c0_1 = arith.constant 0 : index
    %c0_2 = arith.constant 0 : index
    %1 = vector.load %arg2[%c0_1, %c0_2] : memref<32x128xbf16, #tpu.memory_space<vmem>>, vector<32x128xbf16>
    %cst = arith.constant dense<0.000000e+00> : vector<16x128xf32>
    %2 = tpu.matmul %0, %1, %cst {dimension_numbers = #tpu.dot_dimension_numbers<[1], [0], [0], [1], [0, 0, 1, 1], [], []>} : vector<16x32xbf16>, vector<32x128xbf16>, vector<16x128xf32> -> vector<16x128xf32>
    %c0_3 = arith.constant 0 : index
    %c0_4 = arith.constant 0 : index
    %3 = vector.load %arg5[%c0_3, %c0_4] : memref<1x128xf32, #tpu.memory_space<vmem>>, vector<1x128xf32>
    %4 = vector.broadcast %3 : vector<1x128xf32> to vector<16x128xf32>
    %5 = arith.addf %2, %4 : vector<16x128xf32>
    %cst_5 = arith.constant 0.000000e+00 : f32
    %6 = vector.broadcast %cst_5 : f32 to vector<16x128xf32>
    %7 = arith.maximumf %5, %6 : vector<16x128xf32>
    %8 = arith.truncf %7 : vector<16x128xf32> to vector<16x128xbf16>
    %c0_6 = arith.constant 0 : index
    %c0_7 = arith.constant 0 : index
    %9 = vector.load %arg3[%c0_6, %c0_7] : memref<128x128xbf16, #tpu.memory_space<vmem>>, vector<128x128xbf16>
    %cst_8 = arith.constant dense<0.000000e+00> : vector<16x128xf32>
    %10 = tpu.matmul %8, %9, %cst_8 {dimension_numbers = #tpu.dot_dimension_numbers<[1], [0], [0], [1], [0, 0, 1, 1], [], []>} : vector<16x128xbf16>, vector<128x128xbf16>, vector<16x128xf32> -> vector<16x128xf32>
    %c0_9 = arith.constant 0 : index
    %c0_10 = arith.constant 0 : index
    %11 = vector.load %arg6[%c0_9, %c0_10] : memref<1x128xf32, #tpu.memory_space<vmem>>, vector<1x128xf32>
    %12 = vector.broadcast %11 : vector<1x128xf32> to vector<16x128xf32>
    %13 = arith.addf %10, %12 : vector<16x128xf32>
    %cst_11 = arith.constant 0.000000e+00 : f32
    %14 = vector.broadcast %cst_11 : f32 to vector<16x128xf32>
    %15 = arith.maximumf %13, %14 : vector<16x128xf32>
    %16 = arith.truncf %15 : vector<16x128xf32> to vector<16x128xbf16>
    %c0_12 = arith.constant 0 : index
    %c0_13 = arith.constant 0 : index
    %17 = vector.load %arg4[%c0_12, %c0_13] : memref<128x128xbf16, #tpu.memory_space<vmem>>, vector<128x128xbf16>
    %cst_14 = arith.constant dense<0.000000e+00> : vector<16x128xf32>
    %18 = tpu.matmul %16, %17, %cst_14 {dimension_numbers = #tpu.dot_dimension_numbers<[1], [0], [0], [1], [0, 0, 1, 1], [], []>} : vector<16x128xbf16>, vector<128x128xbf16>, vector<16x128xf32> -> vector<16x128xf32>
    %c0_15 = arith.constant 0 : index
    %c0_16 = arith.constant 0 : index
    %19 = vector.load %arg7[%c0_15, %c0_16] : memref<1x128xf32, #tpu.memory_space<vmem>>, vector<1x128xf32>
    %20 = vector.broadcast %19 : vector<1x128xf32> to vector<16x128xf32>
    %21 = arith.addf %18, %20 : vector<16x128xf32>
    %22 = arith.negf %21 : vector<16x128xf32>
    %23 = math.exp %22 : vector<16x128xf32>
    %cst_17 = arith.constant 1.000000e+00 : f32
    %24 = vector.broadcast %cst_17 : f32 to vector<16x128xf32>
    %25 = arith.addf %24, %23 : vector<16x128xf32>
    %26 = arith.divf %24, %25 : vector<16x128xf32>
    %27 = arith.truncf %26 : vector<16x128xf32> to vector<16x128xbf16>
    %c0_18 = arith.constant 0 : index
    %c0_19 = arith.constant 0 : index
    %28 = vector.load %arg8[%c0_18, %c0_19] : memref<16x128xbf16, #tpu.memory_space<vmem>>, vector<16x128xbf16>
    tpu.vector_store %arg8[%c0_18, %c0_19], %27 {strides = array<i32>} : memref<16x128xbf16, #tpu.memory_space<vmem>>, vector<16x128xbf16>,
    return
  }
  func.func @transform_0(%arg0: i32) -> (i32, i32) {
    %c0_i32 = arith.constant 0 : i32
    %c0_i32_0 = arith.constant 0 : i32
    return %arg0, %c0_i32 : i32, i32
  }
  func.func @transform_1(%arg0: i32) -> (i32, i32) {
    %c0_i32 = arith.constant 0 : i32
    %c0_i32_0 = arith.constant 0 : i32
    %c0_i32_1 = arith.constant 0 : i32
    return %c0_i32, %c0_i32_0 : i32, i32
  }
  func.func @transform_2(%arg0: i32) -> (i32, i32) {
    %c0_i32 = arith.constant 0 : i32
    %c0_i32_0 = arith.constant 0 : i32
    %c0_i32_1 = arith.constant 0 : i32
    return %c0_i32, %c0_i32_0 : i32, i32
  }
  func.func @transform_3(%arg0: i32) -> (i32, i32) {
    %c0_i32 = arith.constant 0 : i32
    %c0_i32_0 = arith.constant 0 : i32
    %c0_i32_1 = arith.constant 0 : i32
    return %c0_i32, %c0_i32_0 : i32, i32
  }
  func.func @transform_4(%arg0: i32) -> (i32, i32) {
    %c0_i32 = arith.constant 0 : i32
    %c0_i32_0 = arith.constant 0 : i32
    %c0_i32_1 = arith.constant 0 : i32
    return %c0_i32, %c0_i32_0 : i32, i32
  }
  func.func @transform_5(%arg0: i32) -> (i32, i32) {
    %c0_i32 = arith.constant 0 : i32
    %c0_i32_0 = arith.constant 0 : i32
    %c0_i32_1 = arith.constant 0 : i32
    return %c0_i32, %c0_i32_0 : i32, i32
  }
  func.func @transform_6(%arg0: i32) -> (i32, i32) {
    %c0_i32 = arith.constant 0 : i32
    %c0_i32_0 = arith.constant 0 : i32
    %c0_i32_1 = arith.constant 0 : i32
    return %c0_i32, %c0_i32_0 : i32, i32
  }
  func.func @transform_7(%arg0: i32) -> (i32, i32) {
    %c0_i32 = arith.constant 0 : i32
    %c0_i32_0 = arith.constant 0 : i32
    return %arg0, %c0_i32 : i32, i32
  }
}

</mosaic_0001>

<bundles_post_ra>
// kernel: mlp_pallas.1
= control target key start
LH: loop header
LB: loop body
LE: loop exit
PB: predicated region body
PF: predicated region fallthrough
CT: control target
= control target key end

     0   :  { %12 = vsyncpa [#allocation3], 0  ;;  %s665_s0 = inlined_call_operand.vmem [shape: bf16[16,32], index: 0, kind: input, shape index: {}]   ;;  %s666_s1 = inlined_call_operand.vmem [shape: bf16[32,128], index: 1, kind: input, shape index: {}]   ;;  %s667_s2 = inlined_call_operand.hbm [shape: bf16[128,128], index: 2, kind: input, shape index: {}]   ;;  %s668_s3 = inlined_call_operand.hbm [shape: bf16[128,128], index: 3, kind: input, shape index: {}]   ;;  %s669_s4 = inlined_call_operand.vmem [shape: f32[1,128], index: 4, kind: input, shape index: {}]   ;;  %s670_s5 = inlined_call_operand.vmem [shape: f32[1,128], index: 5, kind: input, shape index: {}]   ;;  %s671_s6 = inlined_call_operand.vmem [shape: f32[1,128], index: 6, kind: input, shape index: {}]   ;;  %s672_s7 = inlined_call_operand.vmem [shape: bf16[16,128], index: 7, kind: output, shape index: {}]  }
   0x1   :  { %13 = vsyncpa [#allocation5], 0  ;;  %s568_s24 = smov [#allocation2]  }
   0x2   :  { %s23_s25 = sshll.u32 %s568_s24, 4  ;;  %s24_s25 = int_to_ptr.vmem [resolvable:$true] %s23_s25 }
   0x3   :  { %s532_s26 = scalar_lea.vmem %s24_s25, 1024  ;;  %p537_p1 = scmp.lt.s32.totalorder %s24_s25, %s24_s25 }
   0x4   :  { %p533_p0 = scmp.ne.s32.totalorder %s24_s25, %s532_s26  ;;  %p538_p2 = scmp.lt.s32.totalorder %s532_s26, %s532_s26 }
   0x6   :  { %p539_p3 = por %p538_p2, %p537_p1 }
   0x8   :  { %p540_p4 = pnand %p539_p3, %p533_p0 }
   0xa   :  { %543 = shalt.err (!%p540_p4)
}
   0xb   :  { %s569_s27 = smov 64   ;;  %s570_s28 = smov 4  }
   0xc   :  { %29 = dma.hbm_to_vmem [thread:$0]  %s667_s2, 1024, %s24_s25, [#allocation3], %s569_s27, %s569_s27, %s570_s28  }
   0xd   :  { %s571_s8 = smov [#allocation4]  }
   0xe   :  { %s35_s9 = sshll.u32 %s571_s8, 4  ;;  %s36_s9 = int_to_ptr.vmem [resolvable:$true] %s35_s9 }
   0xf   :  { %s552_s10 = scalar_lea.vmem %s36_s9, 1024  ;;  %p557_p6 = scmp.lt.s32.totalorder %s36_s9, %s36_s9 }
  0x10   :  { %p553_p5 = scmp.ne.s32.totalorder %s36_s9, %s552_s10  ;;  %p558_p7 = scmp.lt.s32.totalorder %s552_s10, %s552_s10 }
  0x12   :  { %p559_p8 = por %p558_p7, %p557_p6 }
  0x14   :  { %p560_p9 = pnand %p559_p8, %p553_p5 }
  0x16   :  { %563 = shalt.err (!%p560_p9)
}
  0x17   :  { %41 = dma.hbm_to_vmem [thread:$0]  %s668_s3, 1024, %s36_s9, [#allocation5], %s569_s27, %s569_s27, %s570_s28  }
  0x18   :  { %564 = dma.done.wait [#allocation3], 1024  }
  0x19   :  { %565 = vsyncadd [#allocation3], 4294966272 }
  0x1a   :  { %566 = dma.done.wait [#allocation5], 1024  }
  0x1b   :  { %567 = vsyncadd [#allocation5], 4294966272  ;;  %v572_v0 = vmov 0.0   ;;  %vm573_vm0 = vmmov 0   ;;  %v497_v1 = vld [vmem:[%s666_s1 + $0x8] sm:$0xff]   ;;  %v498_v2 = vld [vmem:[%s666_s1] sm:$0xff]  }
  0x1c   :  { %443 = vmatprep.subr.bf16.mxu0 %v572_v0  ;;  %447 = vmatprep.mubr.msk.bf16.mxu0 %vm573_vm0, %v572_v0  ;;  %v500_v3 = vld [vmem:[#allocation2 + $0x38] sm:$0xff]   ;;  %v499_v4 = vld [vmem:[%s665_s0] sm:$0xff]   ;;  %v501_v5 = vld [vmem:[#allocation2 + $0x30] sm:$0xff]   ;;  %vm85_vm1 = vcmask 261120  }
  0x1d   :  { %451 = vmatprep.subr.bf16.mxu1 %v572_v0  ;;  %467 = vmatprep.mubr.msk.bf16.mxu1 %vm573_vm0, %v572_v0  ;;  %v502_v6 = vld [vmem:[#allocation2 + $0x28] sm:$0xff]   ;;  %v503_v7 = vld [vmem:[#allocation2 + $0x20] sm:$0xff]   ;;  %v504_v8 = vld [vmem:[#allocation2 + $0x18] sm:$0xff]  }
  0x1e   :  { %444 = vmatpush3.bf16.msra.mxu0 %v497_v1  ;;  %452 = vmatpush3.bf16.msra.mxu1 %v500_v3  ;;  %v505_v9 = vld [vmem:[#allocation2 + $0x10] sm:$0xff]   ;;  %v506_v10 = vld [vmem:[#allocation2 + $0x8] sm:$0xff]   ;;  %v507_v11 = vld [vmem:[#allocation2] sm:$0xff]  }
  0x1f   :  { %445 = vmatprep.subr.bf16.mxu0 %v572_v0  ;;  %453 = vmatprep.subr.bf16.mxu1 %v572_v0  ;;  %v508_v12 = vld [vmem:[#allocation4 + $0x38] sm:$0xff]   ;;  %v509_v13 = vld [vmem:[#allocation4 + $0x30] sm:$0xff]   ;;  %v510_v14 = vld [vmem:[#allocation4 + $0x28] sm:$0xff]  }
  0x20   :  { %v511_v15 = vld [vmem:[#allocation4 + $0x20] sm:$0xff]   ;;  %v512_v16 = vld [vmem:[#allocation4 + $0x18] sm:$0xff]   ;;  %v513_v27 = vld [vmem:[#allocation4 + $0x10] sm:$0xff]  }
  0x21   :  { %v388_v17 = vld [vmem:[%s669_s4] ss:$0 sm:$0xff]  ;;  %v514_v28 = vld [vmem:[#allocation4 + $0x8] sm:$0xff]  }
  0x22   :  { %446 = vmatpush3.bf16.msra.mxu0 %v498_v2  ;;  %454 = vmatpush3.bf16.msra.mxu1 %v501_v5  ;;  %v515_v29 = vld [vmem:[#allocation4] sm:$0xff]  }
  0x23   :  { %471 = vmatprep.subr.bf16.mxu0 %v572_v0  ;;  %455 = vmatprep.subr.bf16.mxu1 %v572_v0  ;;  %v393_v30 = vld [vmem:[%s670_s5] ss:$0 sm:$0xff] }
  0x24   :  { %v402_v40 = vld [vmem:[%s671_s6] ss:$0 sm:$0xff] }
  0x25   :  { %448 = vmatmul.mubr.msk.bf16.vlgmr.msra.gmra.mxu0 %vm85_vm1, %v499_v4 }
  0x26   :  { %487 = vmatprep.mubr.msk.bf16.mxu0 %vm573_vm0, %v572_v0  ;;  %456 = vmatpush3.bf16.msra.mxu1 %v502_v6 }
  0x27   :  { %457 = vmatprep.subr.bf16.mxu1 %v572_v0  ;;  %472 = vmatpush3.bf16.msra.mxu0 %v508_v12 }
  0x28   :  { %473 = vmatprep.subr.bf16.mxu0 %v572_v0 }
  0x2a   :  { %458 = vmatpush3.bf16.msra.mxu1 %v503_v7 }
  0x2b   :  { %459 = vmatprep.subr.bf16.mxu1 %v572_v0  ;;  %474 = vmatpush3.bf16.msra.mxu0 %v509_v13 }
  0x2c   :  { %475 = vmatprep.subr.bf16.mxu0 %v572_v0 }
  0x2e   :  { %460 = vmatpush3.bf16.msra.mxu1 %v504_v8 }
  0x2f   :  { %461 = vmatprep.subr.bf16.mxu1 %v572_v0  ;;  %476 = vmatpush3.bf16.msra.mxu0 %v510_v14 }
  0x30   :  { %477 = vmatprep.subr.bf16.mxu0 %v572_v0 }
  0x32   :  { %462 = vmatpush3.bf16.msra.mxu1 %v505_v9 }
  0x33   :  { %463 = vmatprep.subr.bf16.mxu1 %v572_v0  ;;  %478 = vmatpush3.bf16.msra.mxu0 %v511_v15 }
  0x34   :  { %479 = vmatprep.subr.bf16.mxu0 %v572_v0 }
  0x36   :  { %464 = vmatpush3.bf16.msra.mxu1 %v506_v10 }
  0x37   :  { %465 = vmatprep.subr.bf16.mxu1 %v572_v0  ;;  %480 = vmatpush3.bf16.msra.mxu0 %v512_v16 }
  0x38   :  { %481 = vmatprep.subr.bf16.mxu0 %v572_v0 }
  0x3a   :  { %466 = vmatpush3.bf16.msra.mxu1 %v507_v11 }
  0x3b   :  { %482 = vmatpush3.bf16.msra.mxu0 %v513_v27 }
  0x3c   :  { %483 = vmatprep.subr.bf16.mxu0 %v572_v0 }
  0x3f   :  { %484 = vmatpush3.bf16.msra.mxu0 %v514_v28 }
  0x40   :  { %485 = vmatprep.subr.bf16.mxu0 %v572_v0 }
  0x43   :  { %486 = vmatpush3.bf16.msra.mxu0 %v515_v29 }
  0xe5   :  { %v123_v18 = vpop.f32.mrf.mxu0 }
  0xe6   :  { %v124_v20 = vadd.f32 %v388_v17, %v123_v18 }
  0xe7   :  { %v449_v19 = vpop.f32.mrf.mxu0 }
  0xe8   :  { %v130_v24 = vmax.f32 %v124_v20, 0.0 }
  0xe9   :  { %v126_v21 = vpop.f32.mrf.mxu0 }
  0xea   :  { %v127_v22 = vadd.f32 %v388_v17, %v126_v21 }
  0xeb   :  { %v450_v23 = vpop.f32.mrf.mxu0 }
  0xec   :  { %v131_v25 = vmax.f32 %v127_v22, 0.0 }
  0xee   :  { %v132_v26 = vpack.c.bf16 %v131_v25, %v130_v24 }
  0xf0   :  { %468 = vmatmul.mubr.bf16.vlgmr.msra.gmra.mxu1 %v132_v26 }
 0x1b0   :  { %v238_v31 = vpop.f32.mrf.mxu1 }
 0x1b1   :  { %v239_v33 = vadd.f32 %v393_v30, %v238_v31 }
 0x1b2   :  { %v469_v32 = vpop.f32.mrf.mxu1 }
 0x1b3   :  { %v245_v37 = vmax.f32 %v239_v33, 0.0 }
 0x1b4   :  { %v241_v34 = vpop.f32.mrf.mxu1 }
 0x1b5   :  { %v242_v35 = vadd.f32 %v393_v30, %v241_v34 }
 0x1b6   :  { %v470_v36 = vpop.f32.mrf.mxu1 }
 0x1b7   :  { %v246_v38 = vmax.f32 %v242_v35, 0.0 }
 0x1b9   :  { %v247_v39 = vpack.c.bf16 %v246_v38, %v245_v37 }
 0x1bb   :  { %488 = vmatmul.mubr.bf16.vlgmr.msra.gmra.mxu0 %v247_v39 }
 0x27b   :  { %v353_v41 = vpop.f32.mrf.mxu0 }
 0x27c   :  { %v354_v42 = vadd.f32 %v402_v40, %v353_v41 }
 0x27d   :  { %v489_v43 = vpop.f32.mrf.mxu0 }
 0x27e   :  { %v411_v44 = vmul.f32 -1.442695, %v354_v42 }
 0x27f   :  { %v356_v45 = vpop.f32.mrf.mxu0 }
 0x280   :  { %516 = vpow2.f32 %v411_v44  ;;  %v357_v46 = vadd.f32 %v402_v40, %v356_v45 }
 0x281   :  { %v490_v47 = vpop.f32.mrf.mxu0 }
 0x282   :  { %v412_v48 = vmul.f32 -1.442695, %v357_v46 }
 0x284   :  { %518 = vpow2.f32 %v412_v48 }
 0x28d   :  { %v517_v49 = vpop.eup %516 }
 0x28e   :  { %v366_v50 = vadd.f32 1.0, %v517_v49 }
 0x290   :  { %520 = vrcp.f32 %v366_v50 }
 0x291   :  { %v519_v51 = vpop.eup %518 }
 0x292   :  { %v367_v52 = vadd.f32 1.0, %v519_v51 }
 0x294   :  { %522 = vrcp.f32 %v367_v52 }
 0x29d   :  { %v521_v53 = vpop.eup %520 }
 0x2a1   :  { %v523_v54 = vpop.eup %522 }
 0x2a2   :  { %v420_v55 = vpack.c.bf16 %v523_v54, %v521_v53 }
 0x2a4   :  { %421 = vst [vmem:[%s672_s7] sm:$0xff] %v420_v55  }
 0x2a5   :  { %386 = vsyncpa [#allocation3], 1 }
 0x2a6   :  { %387 = vsyncpa [#allocation5], 1 }

</bundles_post_ra>
